<compile_context>
chip_gen: v7x
topology: tpu7x:2x2x1
jax: 0.10.0
libtpu: 0.0.40
codegen_flags: <defaults>
</compile_context>

<pallas_src>
import functools

import jax
import jax.numpy as jnp
from jax.experimental import pallas as pl
from jax.experimental.pallas import tpu as pltpu


def _round_up(n, m):
    return ((n + m - 1) // m) * m


_VMEM_LIMIT = 32 * 1024 * 1024  # raise v5e's 16 MiB scoped default; blocks stay << this


# ----------------------------------------------------------------------------
# Pallas kernels
# ----------------------------------------------------------------------------
def _focal_loss_kernel(logits_ref, classes_ref, out_ref, *, alpha, gamma, expanded):
    """Sigmoid focal loss partial sums for one (layer, lane-tile) grid cell.

    logits_ref : [1, R, PT]  R = k*C rows (sublane-packed when C < 8), queries on lanes
    classes_ref: [1, R, PT]  int32 "key" (== 0 where one-hot is 1)    when expanded
                 [1, 1, PT]  int32 class ids in [0, C] (C == no object) when not
    out_ref    : [1, 1, 1, 128] lane-dense per-lane partial sums for this grid cell
    """
    x = logits_ref[0].astype(jnp.float32)                  # (R, PT)
    R, PT = x.shape
    cls = classes_ref[0]                                   # int32

    if expanded:
        # key = label - row_class precomputed in the wrapper; one compare builds the one-hot.
        t = (cls == 0).astype(jnp.float32)                 # (R, PT)
    else:
        row_iota = jax.lax.broadcasted_iota(jnp.int32, (R, PT), 0)
        t = (row_iota == cls).astype(jnp.float32)          # class id C never matches

    # sigmoid via tanh: one EUP transcendental instead of exp + reciprocal.
    prob = 0.5 * jnp.tanh(0.5 * x) + 0.5
    # BCE-with-logits: max(x,0) - x*t + log1p(exp(-|x|)); the log1p term equals
    # -log(max(prob, 1-prob)) -> reuses prob, one EUP op (log).
    ce = jnp.maximum(x, 0.0) - x * t - jnp.log(jnp.maximum(prob, 1.0 - prob))
    p_t = prob * t + (1.0 - prob) * (1.0 - t)
    omp = 1.0 - p_t
    if gamma == 0:
        loss = ce
    else:
        mod = omp
        for _ in range(int(gamma) - 1):                    # integer gamma -> multiplies
            mod = mod * omp
        loss = ce * mod
    if alpha >= 0:
        loss = (alpha * t + (1.0 - alpha) * (1.0 - t)) * loss
    # NOTE: padded lanes carry logit -1e4 and the no-object class -> exactly 0 loss,
    # so no validity mask is needed.

    # Fold the lane tile into 128-wide strips with aligned VPU adds (no cross-lane
    # shuffles), then a tiny sublane reduce; the final 128-lane sum happens in the
    # wrapper.  The store is a single lane-dense (1,128) write.
    acc = loss[:, 0:128]
    for g in range(1, PT // 128):
        acc = acc + loss[:, g * 128:(g + 1) * 128]
    out_ref[0, 0, :, :] = jnp.sum(acc, axis=0, keepdims=True)


def _box3d_loss_kernel(src_ref, tgt_ref, out_ref, *, eps):
    """L1 box / rad partials and (1 - GIoU3d) partials for a chunk of layers.

    src_ref/tgt_ref: [Lc, 8, Np] coordinate-major (cx,cy,cz,l,w,h,rad0,rad1) x boxes.
    out_ref        : [1, 3, Lc, 128]  rows: 0=bbox, 1=giou, 2=rad per-lane partials.
    Padded columns / padded layers hold the identical box [0,0,0,1,1,1,0,0] in src AND
    tgt, which contributes exactly 0 to all three sums (L1 diff 0, GIoU == 1).
    """
    s = src_ref[...].astype(jnp.float32)                   # (Lc, 8, Np)
    t = tgt_ref[...].astype(jnp.float32)
    Lc, _, Np = s.shape

    diff = jnp.abs(s - t)
    bbox_lane = jnp.sum(diff[:, 0:6, :], axis=1)           # (Lc, Np)
    rad_lane = jnp.sum(diff[:, 6:8, :], axis=1)

    # box_cxcyczlwh_to_xyxyxy on coordinate rows (boxes live on the lane axis)
    s_min = s[:, 0:3, :] - 0.5 * s[:, 3:6, :]
    s_max = s[:, 0:3, :] + 0.5 * s[:, 3:6, :]
    t_min = t[:, 0:3, :] - 0.5 * t[:, 3:6, :]
    t_max = t[:, 0:3, :] + 0.5 * t[:, 3:6, :]

    def _vol(d):                                           # (Lc, 3, Np) -> (Lc, Np)
        return d[:, 0, :] * d[:, 1, :] * d[:, 2, :]

    vol_s = _vol(s_max - s_min)
    vol_t = _vol(t_max - t_min)
    inter = _vol(jnp.maximum(jnp.minimum(s_max, t_max) - jnp.maximum(s_min, t_min), 0.0))
    union = vol_s + vol_t - inter
    enc = _vol(jnp.maximum(s_max, t_max) - jnp.minimum(s_min, t_min))

    iou = inter / jnp.maximum(union, eps)
    giou = iou - (enc - union) / jnp.maximum(enc, eps)     # diag of generalized_box3d_iou
    giou_lane = 1.0 - giou                                 # (Lc, Np)

    def _fold(a):                                          # (Lc, Np) -> (Lc, 128)
        acc = a[:, 0:128]
        for g in range(1, Np // 128):
            acc = acc + a[:, g * 128:(g + 1) * 128]
        return acc

    out_ref[0, 0, :, :] = _fold(bbox_lane)
    out_ref[0, 1, :, :] = _fold(giou_lane)
    out_ref[0, 2, :, :] = _fold(rad_lane)


# ----------------------------------------------------------------------------
# Pallas wrappers (layer-fused)
# ----------------------------------------------------------------------------
def focal_loss_sums_pallas(logits_stack, classes_stack, alpha=0.25, gamma=2):
    """Per-layer sigmoid focal loss sums.

    logits_stack : [L, B, Q, C]  (any float dtype; cast to f32 in-kernel)
    classes_stack: [L, B, Q]     int32 in [0, C]; C means "no object"
    returns      : [L] float32 sums
    """
    L, B, Q, C = logits_stack.shape
    lanes = B * Q

    # sublane packing factor: fill the 8-sublane f32 vreg when C < 8
    k = max(1, 8 // C)
    packed0 = -(-lanes // k)
    PT = min(4096, _round_up(packed0, 128))                # big lane tiles (feedback #1)
    packed_p = _round_up(packed0, PT)
    n_t = packed_p // PT
    lanes_p = packed_p * k

    # classes-major layout, queries on the 128-lane axis
    lg = jnp.transpose(logits_stack, (0, 3, 1, 2)).reshape(L, C, lanes)
    cl = classes_stack.astype(jnp.int32).reshape(L, lanes)
    if lanes_p != lanes:
        # -1e4 logit + no-object class padding -> padded lanes give exactly 0 loss,
        # so no in-kernel validity mask is needed.
        lg = jnp.pad(lg, ((0, 0), (0, 0), (0, lanes_p - lanes)), constant_values=-1e4)
        cl = jnp.pad(cl, ((0, 0), (0, lanes_p - lanes)), constant_values=C)

    expanded = k > 1
    rows = k * C
    if expanded:
        # pack k query groups onto the sublane axis: row r = g*C + c
        lg = lg.reshape(L, C, k, packed_p).transpose(0, 2, 1, 3).reshape(L, rows, packed_p)
        cls_k = cl.reshape(L, k, packed_p)
        c_off = jnp.arange(C, dtype=jnp.int32)
        # "key" = label - row_class; key == 0 <=> one-hot == 1 (no-object / pad never 0)
        cl_in = (cls_k[:, :, None, :] - c_off[None, None, :, None]).reshape(L, rows, packed_p)
        cls_rows = rows
    else:
        cl_in = cl.reshape(L, 1, lanes_p)
        cls_rows = 1

    kernel = functools.partial(_focal_loss_kernel, alpha=float(alpha),
                               gamma=int(gamma), expanded=expanded)
    partials = pl.pallas_call(
        kernel,
        out_shape=jax.ShapeDtypeStruct((L, n_t, 1, 128), jnp.float32),
        grid=(L, n_t),
        in_specs=[
            pl.BlockSpec((1, rows, PT), lambda l, t: (l, 0, t)),
            pl.BlockSpec((1, cls_rows, PT), lambda l, t: (l, 0, t)),
        ],
        out_specs=pl.BlockSpec((1, 1, 1, 128), lambda l, t: (l, t, 0, 0)),
        compiler_params=pltpu.CompilerParams(
            dimension_semantics=("parallel", "parallel"),
            vmem_limit_bytes=_VMEM_LIMIT,
            allow_input_fusion=[True, True]),
    )(lg, cl_in)
    return jnp.sum(partials, axis=(1, 2, 3))


def box3d_loss_sums_pallas(src_stack, tgt_stack, eps=1e-7):
    """Per-layer L1 / GIoU3d / rad loss sums for matched box pairs.

    src_stack, tgt_stack: [L, N, 8]  (cx, cy, cz, l, w, h, rad0, rad1)
    returns             : (bbox_sums [L], giou_sums [L], rad_sums [L])
    """
    L, N, D = src_stack.shape
    Np = max(_round_up(max(N, 1), 128), 128)

    # layer-chunked grid: at most 2 parallel steps (keeps both v7x TCs busy while
    # amortizing the ~0.35 us per-step overhead; the arrays are tiny).
    n_steps = 2 if L >= 2 else 1
    Lc = -(-L // n_steps)
    L_pad = Lc * n_steps

    pad_vals = jnp.array([0., 0., 0., 1., 1., 1., 0., 0.], dtype=jnp.float32)

    def _prep(x):
        xt = jnp.transpose(x, (0, 2, 1))                   # [L, 8, N] coord-major
        if Np > N:
            cols = jnp.broadcast_to(pad_vals.astype(x.dtype)[None, :, None],
                                    (L, D, Np - N))
            xt = jnp.concatenate([xt, cols], axis=2)
        if L_pad > L:
            layers = jnp.broadcast_to(pad_vals.astype(x.dtype)[None, :, None],
                                      (L_pad - L, D, Np))
            xt = jnp.concatenate([xt, layers], axis=0)
        return xt

    s = _prep(src_stack)
    t = _prep(tgt_stack)

    kernel = functools.partial(_box3d_loss_kernel, eps=float(eps))
    partials = pl.pallas_call(
        kernel,
        out_shape=jax.ShapeDtypeStruct((n_steps, 3, Lc, 128), jnp.float32),
        grid=(n_steps,),
        in_specs=[
            pl.BlockSpec((Lc, D, Np), lambda step: (step, 0, 0)),
            pl.BlockSpec((Lc, D, Np), lambda step: (step, 0, 0)),
        ],
        out_specs=pl.BlockSpec((1, 3, Lc, 128), lambda step: (step, 0, 0, 0)),
        compiler_params=pltpu.CompilerParams(
            dimension_semantics=("parallel",),
            vmem_limit_bytes=_VMEM_LIMIT),
    )(s, t)

    sums = jnp.sum(partials, axis=-1)                      # (n_steps, 3, Lc)
    per_layer = jnp.transpose(sums, (1, 0, 2)).reshape(3, L_pad)[:, :L]
    return per_layer[0], per_layer[1], per_layer[2]


# ----------------------------------------------------------------------------
# Plain-JAX glue (gathers by matcher indices are data-dependent -> outside kernels)
# ----------------------------------------------------------------------------
def _get_src_permutation_idx(indices):
    batch_idx = jnp.concatenate(
        [jnp.full_like(src, i) for i, (src, _) in enumerate(indices)])
    src_idx = jnp.concatenate([src for src, _ in indices])
    return batch_idx, src_idx


def _build_target_classes(src_logits_shape, targets, indices, num_classes):
    B, Q = src_logits_shape[0], src_logits_shape[1]
    batch_idx, src_idx = _get_src_permutation_idx(indices)
    target_classes_o = jnp.concatenate(
        [t["labels"][J] for t, (_, J) in zip(targets, indices)]).astype(jnp.int32)
    target_classes = jnp.full((B, Q), num_classes, dtype=jnp.int32)
    target_classes = target_classes.at[batch_idx, src_idx].set(target_classes_o)
    return target_classes, target_classes_o, (batch_idx, src_idx)


def _gather_box_pairs(pred_boxes, targets, indices):
    batch_idx, src_idx = _get_src_permutation_idx(indices)
    src = pred_boxes[batch_idx, src_idx]                                    # [N, 8]
    tgt = jnp.concatenate(
        [t["boxes"][i] for t, (_, i) in zip(targets, indices)], axis=0)     # [N, 8]
    return src, tgt


# ----------------------------------------------------------------------------
# Loss modules
# ----------------------------------------------------------------------------
class Boxes3DLoss:
    """Single-layer box loss (kept for API parity; Boxer3DLoss.forward uses the
    layer-fused path)."""

    def __call__(self, outputs, targets, indices, num_boxes):
        assert "pred_boxes" in outputs
        src, tgt = _gather_box_pairs(outputs["pred_boxes"], targets, indices)
        bbox_s, giou_s, rad_s = box3d_loss_sums_pallas(src[None], tgt[None])
        return {"loss_bbox": bbox_s[0] / num_boxes,
                "loss_giou": giou_s[0] / num_boxes,
                "loss_rad": rad_s[0] / num_boxes}


class FocalLabelLoss:
    def __init__(self, num_classes, focal_alpha):
        self.num_classes = num_classes
        self.focal_alpha = focal_alpha
        self.target_classes = None
        self.src_logits = None

    def __call__(self, outputs, targets, indices, num_boxes):
        assert "pred_logits" in outputs
        src_logits = outputs["pred_logits"]
        tc, tco, (bi, si) = _build_target_classes(
            src_logits.shape, targets, indices, self.num_classes)
        self.src_logits = src_logits[bi, si]
        self.target_classes = tco
        ce = focal_loss_sums_pallas(src_logits[None], tc[None],
                                    alpha=self.focal_alpha, gamma=2)[0]
        return {"loss_ce": ce / num_boxes}


class Boxer3DLoss:
    def __init__(self, num_classes, matcher, weight_dict, losses, iter_per_update):
        self.num_classes = num_classes
        self.matcher = matcher
        self.weight_dict = weight_dict
        self.losses = losses
        self.iter_per_update = iter_per_update
        self.boxer3d_losses = {}
        self.boxer3d_enc_losses = {}
        for loss in losses:
            if loss == "boxes":
                self.boxer3d_losses[loss] = Boxes3DLoss()
                self.boxer3d_enc_losses[loss + "_enc"] = Boxes3DLoss()
            elif loss == "focal_labels":
                self.boxer3d_losses[loss] = FocalLabelLoss(num_classes, 0.25)
                self.boxer3d_enc_losses[loss + "_enc"] = FocalLabelLoss(1, 0.25)
            else:
                raise ValueError(
                    "Only boxes|focal_labels are supported for boxer3d losses. "
                    "Found {}".format(loss))

    def get_target_classes(self):
        for kk in self.boxer3d_losses.keys():
            if "labels" in kk:
                return (self.boxer3d_losses[kk].src_logits,
                        self.boxer3d_losses[kk].target_classes)

    def _fused_layer_losses(self, layers, targets, focal_mod):
        """layers: list of (key_suffix, layer_outputs). One matcher call per layer,
        then ONE pallas_call per loss family across all layers."""
        losses = {}
        per_layer_indices = [self.matcher(lo, targets) for _, lo in layers]
        last = len(layers) - 1

        if "focal_labels" in self.losses:
            cls_stack = []
            for li, ((_suffix, lo), indices) in enumerate(zip(layers, per_layer_indices)):
                tc, tco, (bi, si) = _build_target_classes(
                    lo["pred_logits"].shape, targets, indices, focal_mod.num_classes)
                cls_stack.append(tc)
                if li == last:
                    # only the retained layer pays for the matched-logits gather
                    # (reference overwrites per call; only the last call's state survives)
                    focal_mod.src_logits = lo["pred_logits"][bi, si]
                    focal_mod.target_classes = tco
            ce_sums = focal_loss_sums_pallas(
                jnp.stack([lo["pred_logits"] for _, lo in layers], axis=0),
                jnp.stack(cls_stack, axis=0),
                alpha=focal_mod.focal_alpha, gamma=2)
            for li, (suffix, _) in enumerate(layers):
                losses["loss_ce" + suffix] = ce_sums[li]

        if "boxes" in self.losses:
            src_stack, tgt_stack = [], []
            for (_, lo), indices in zip(layers, per_layer_indices):
                s, t = _gather_box_pairs(lo["pred_boxes"], targets, indices)
                src_stack.append(s)
                tgt_stack.append(t)
            bbox_sums, giou_sums, rad_sums = box3d_loss_sums_pallas(
                jnp.stack(src_stack, axis=0), jnp.stack(tgt_stack, axis=0))
            for li, (suffix, _) in enumerate(layers):
                losses["loss_bbox" + suffix] = bbox_sums[li]
                losses["loss_giou" + suffix] = giou_sums[li]
                losses["loss_rad" + suffix] = rad_sums[li]
        return losses

    def forward(self, outputs, targets):
        outputs_without_aux = {
            k: v for k, v in outputs.items()
            if k != "aux_outputs" and k != "enc_outputs"}
        if "num_boxes" not in outputs:
            num_boxes = sum(int(t["labels"].shape[0]) for t in targets)
            # TODO(synk): torch.distributed.all_reduce of num_boxes omitted (single host).
            num_boxes = max(float(num_boxes), 1.0)
        else:
            num_boxes = float(outputs["num_boxes"])

        raw = {}

        if "enc_outputs" in outputs:
            bin_targets = [dict(t, labels=jnp.zeros_like(t["labels"])) for t in targets]
            enc_layers = [(f"_enc_{i}", enc)
                          for i, enc in enumerate(outputs["enc_outputs"])]
            enc_focal = self.boxer3d_enc_losses.get(
                "focal_labels_enc", FocalLabelLoss(1, 0.25))
            raw.update(self._fused_layer_losses(enc_layers, bin_targets, enc_focal))

        dec_layers = []
        if "aux_outputs" in outputs:
            dec_layers += [(f"_{i}", aux)
                           for i, aux in enumerate(outputs["aux_outputs"])]
        dec_layers.append(("", outputs_without_aux))
        dec_focal = self.boxer3d_losses.get(
            "focal_labels", FocalLabelLoss(self.num_classes, 0.25))
        raw.update(self._fused_layer_losses(dec_layers, targets, dec_focal))

        return {k: v / num_boxes for k, v in raw.items()}


# TODO(synk): the real Hungarian matcher is an injected dependency of the module;
# a deterministic identity matcher (target j <- query j) is used for the example.
def identity_matcher(outputs, targets):
    return [
        (jnp.arange(t["labels"].shape[0], dtype=jnp.int32),
         jnp.arange(t["labels"].shape[0], dtype=jnp.int32))
        for t in targets
    ]


# ----------------------------------------------------------------------------
# Pure-JAX references (for validation only)
# ----------------------------------------------------------------------------
def _ref_focal_sum(logits, target_classes, alpha=0.25, gamma=2):
    x = logits.astype(jnp.float32)
    C = x.shape[-1]
    t = jax.nn.one_hot(target_classes, C + 1, dtype=jnp.float32)[..., :C]
    prob = jax.nn.sigmoid(x)
    ce = jnp.maximum(x, 0.0) - x * t + jnp.log1p(jnp.exp(-jnp.abs(x)))
    p_t = prob * t + (1.0 - prob) * (1.0 - t)
    loss = ce * (1.0 - p_t) ** gamma
    loss = (alpha * t + (1.0 - alpha) * (1.0 - t)) * loss
    return jnp.sum(loss)


def _ref_box_sums(src, tgt):
    s = src.astype(jnp.float32)
    t = tgt.astype(jnp.float32)
    bbox = jnp.sum(jnp.abs(s[:, :6] - t[:, :6]))
    rad = jnp.sum(jnp.abs(s[:, 6:] - t[:, 6:]))
    s_min, s_max = s[:, :3] - 0.5 * s[:, 3:6], s[:, :3] + 0.5 * s[:, 3:6]
    t_min, t_max = t[:, :3] - 0.5 * t[:, 3:6], t[:, :3] + 0.5 * t[:, 3:6]
    vol_s = jnp.prod(s_max - s_min, axis=-1)
    vol_t = jnp.prod(t_max - t_min, axis=-1)
    inter = jnp.prod(
        jnp.maximum(jnp.minimum(s_max, t_max) - jnp.maximum(s_min, t_min), 0.0), axis=-1)
    union = vol_s + vol_t - inter
    enc = jnp.prod(jnp.maximum(s_max, t_max) - jnp.minimum(s_min, t_min), axis=-1)
    giou = inter / union - (enc - union) / enc
    return bbox, jnp.sum(1.0 - giou), rad


# ----------------------------------------------------------------------------
# Example
# ----------------------------------------------------------------------------
if __name__ == "__main__":
    key = jax.random.PRNGKey(0)
    B, Q, C = 2, 16, 6       # batch, queries, classes (decoder head, k == 1 path)
    NT = 4                   # targets per batch element (static for synthetic run)

    k1, k2, k3, k4, k5, k6 = jax.random.split(key, 6)
    pred_logits = jax.random.normal(k1, (B, Q, C), dtype=jnp.float32)
    centers = jax.random.uniform(k2, (B, Q, 3), minval=-1.0, maxval=1.0)
    sizes = jax.random.uniform(k3, (B, Q, 3), minval=0.2, maxval=1.0)
    rads = jax.random.uniform(k4, (B, Q, 2), minval=-1.0, maxval=1.0)
    pred_boxes = jnp.concatenate([centers, sizes, rads], axis=-1)   # [B, Q, 8]

    # encoder proposals: binary head (C=1, exercises the sublane-packed k=8 path)
    enc_logits = jax.random.normal(k6, (B, Q, 1), dtype=jnp.float32)
    enc_boxes = pred_boxes.at[..., :3].add(0.05)

    targets = []
    for b in range(B):
        kb1, kb2, kb3, kb4 = jax.random.split(jax.random.fold_in(k5, b), 4)
        tc = jax.random.uniform(kb1, (NT, 3), minval=-1.0, maxval=1.0)
        ts = jax.random.uniform(kb2, (NT, 3), minval=0.2, maxval=1.0)
        ta = jax.random.uniform(kb3, (NT, 2), minval=-1.0, maxval=1.0)
        labels = jax.random.randint(kb4, (NT,), 0, C, dtype=jnp.int32)
        targets.append(
            {"boxes": jnp.concatenate([tc, ts, ta], axis=-1), "labels": labels})

    aux_outputs = [{"pred_logits": pred_logits + 0.1, "pred_boxes": pred_boxes}]
    enc_outputs = [{"pred_logits": enc_logits, "pred_boxes": enc_boxes}]
    outputs = {
        "pred_logits": pred_logits,
        "pred_boxes": pred_boxes,
        "aux_outputs": aux_outputs,
        "enc_outputs": enc_outputs,
    }

    criterion = Boxer3DLoss(
        num_classes=C,
        matcher=identity_matcher,
        weight_dict={"loss_ce": 1.0, "loss_bbox": 5.0, "loss_giou": 2.0, "loss_rad": 4.0},
        losses=["boxes", "focal_labels"],
        iter_per_update=1,
    )

    losses = criterion.forward(outputs, targets)
    losses = jax.block_until_ready(losses)
    assert all(bool(jnp.isfinite(v)) for v in losses.values())

    # ----- correctness checks against plain-JAX references (identity matcher) -----
    num_boxes = float(B * NT)

    # main decoder layer + aux layer (non-packed focal path)
    tc_full = jnp.full((B, Q), C, dtype=jnp.int32)
    for b in range(B):
        tc_full = tc_full.at[b, jnp.arange(NT)].set(targets[b]["labels"])
    ce_ref = _ref_focal_sum(pred_logits, tc_full) / num_boxes
    ce_aux_ref = _ref_focal_sum(pred_logits + 0.1, tc_full) / num_boxes
    src_m = jnp.concatenate([pred_boxes[b, :NT] for b in range(B)], axis=0)
    tgt_m = jnp.concatenate([t["boxes"] for t in targets], axis=0)
    bbox_ref, giou_ref, rad_ref = _ref_box_sums(src_m, tgt_m)

    # encoder layer (binary head, sublane-packed focal path)
    tc_enc = jnp.full((B, Q), 1, dtype=jnp.int32)
    tc_enc = tc_enc.at[:, :NT].set(0)
    ce_enc_ref = _ref_focal_sum(enc_logits, tc_enc) / num_boxes
    src_e = jnp.concatenate([enc_boxes[b, :NT] for b in range(B)], axis=0)
    bbox_e_ref, giou_e_ref, rad_e_ref = _ref_box_sums(src_e, tgt_m)

    assert jnp.allclose(losses["loss_ce"], ce_ref, rtol=1e-4, atol=1e-5)
    assert jnp.allclose(losses["loss_ce_0"], ce_aux_ref, rtol=1e-4, atol=1e-5)
    assert jnp.allclose(losses["loss_ce_enc_0"], ce_enc_ref, rtol=1e-4, atol=1e-5)
    assert jnp.allclose(losses["loss_bbox"], bbox_ref / num_boxes, rtol=1e-4, atol=1e-5)
    assert jnp.allclose(losses["loss_giou"], giou_ref / num_boxes, rtol=1e-4, atol=1e-5)
    assert jnp.allclose(losses["loss_rad"], rad_ref / num_boxes, rtol=1e-4, atol=1e-5)
    assert jnp.allclose(losses["loss_bbox_enc_0"], bbox_e_ref / num_boxes, rtol=1e-4, atol=1e-5)
    assert jnp.allclose(losses["loss_giou_enc_0"], giou_e_ref / num_boxes, rtol=1e-4, atol=1e-5)
    assert jnp.allclose(losses["loss_rad_enc_0"], rad_e_ref / num_boxes, rtol=1e-4, atol=1e-5)

    print("KERNEL_OK")
</pallas_src>

<mosaic_0001>
module attributes {stable_mosaic.version = 11 : i64} {
  func.func @_focal_loss_kernel(%arg0: i32, %arg1: i32, %arg2: memref<1x8x128xf32, #tpu.memory_space<vmem>>, %arg3: memref<1x8x128xi32, #tpu.memory_space<vmem>>, %arg4: memref<1x1x1x128xf32, #tpu.memory_space<vmem>>) attributes {dimension_semantics = [#tpu.dimension_semantics<parallel>, #tpu.dimension_semantics<parallel>], iteration_bounds = array<i64: 1, 1>, scalar_prefetch = 0 : i64, scratch_operands = 0 : i64, tpu.core_type = #tpu.core_type<tc>, window_params = [{transform_indices = @transform_0, window_bounds = array<i64: 1, 8, 128>}, {transform_indices = @transform_1, window_bounds = array<i64: 1, 8, 128>}, {transform_indices = @transform_2, window_bounds = array<i64: 1, 1, 1, 128>}]} {
    %c0 = arith.constant 0 : index
    %c0_0 = arith.constant 0 : index
    %c0_1 = arith.constant 0 : index
    %0 = vector.load %arg2[%c0, %c0_0, %c0_1] : memref<1x8x128xf32, #tpu.memory_space<vmem>>, vector<1x8x128xf32>
    %1 = vector.shape_cast %0 : vector<1x8x128xf32> to vector<8x128xf32>
    %c0_2 = arith.constant 0 : index
    %c0_3 = arith.constant 0 : index
    %c0_4 = arith.constant 0 : index
    %2 = vector.load %arg3[%c0_2, %c0_3, %c0_4] : memref<1x8x128xi32, #tpu.memory_space<vmem>>, vector<1x8x128xi32>
    %3 = vector.shape_cast %2 : vector<1x8x128xi32> to vector<8x128xi32>
    %c0_i32 = arith.constant 0 : i32
    %4 = vector.broadcast %c0_i32 : i32 to vector<8x128xi32>
    %5 = arith.cmpi eq, %3, %4 : vector<8x128xi32>
    %6 = arith.extui %5 : vector<8x128xi1> to vector<8x128xi32>
    %7 = arith.sitofp %6 : vector<8x128xi32> to vector<8x128xf32>
    %cst = arith.constant 5.000000e-01 : f32
    %8 = vector.broadcast %cst : f32 to vector<8x128xf32>
    %9 = arith.mulf %8, %1 : vector<8x128xf32>
    %10 = math.tanh %9 : vector<8x128xf32>
    %cst_5 = arith.constant 5.000000e-01 : f32
    %11 = vector.broadcast %cst_5 : f32 to vector<8x128xf32>
    %12 = arith.mulf %11, %10 : vector<8x128xf32>
    %cst_6 = arith.constant 5.000000e-01 : f32
    %13 = vector.broadcast %cst_6 : f32 to vector<8x128xf32>
    %14 = arith.addf %12, %13 : vector<8x128xf32>
    %cst_7 = arith.constant 0.000000e+00 : f32
    %15 = vector.broadcast %cst_7 : f32 to vector<8x128xf32>
    %16 = arith.maximumf %1, %15 : vector<8x128xf32>
    %17 = arith.mulf %1, %7 : vector<8x128xf32>
    %18 = arith.subf %16, %17 : vector<8x128xf32>
    %cst_8 = arith.constant 1.000000e+00 : f32
    %19 = vector.broadcast %cst_8 : f32 to vector<8x128xf32>
    %20 = arith.subf %19, %14 : vector<8x128xf32>
    %21 = arith.maximumf %14, %20 : vector<8x128xf32>
    %22 = math.log %21 : vector<8x128xf32>
    %23 = arith.subf %18, %22 : vector<8x128xf32>
    %24 = arith.mulf %14, %7 : vector<8x128xf32>
    %cst_9 = arith.constant 1.000000e+00 : f32
    %25 = vector.broadcast %cst_9 : f32 to vector<8x128xf32>
    %26 = arith.subf %25, %14 : vector<8x128xf32>
    %cst_10 = arith.constant 1.000000e+00 : f32
    %27 = vector.broadcast %cst_10 : f32 to vector<8x128xf32>
    %28 = arith.subf %27, %7 : vector<8x128xf32>
    %29 = arith.mulf %26, %28 : vector<8x128xf32>
    %30 = arith.addf %24, %29 : vector<8x128xf32>
    %cst_11 = arith.constant 1.000000e+00 : f32
    %31 = vector.broadcast %cst_11 : f32 to vector<8x128xf32>
    %32 = arith.subf %31, %30 : vector<8x128xf32>
    %33 = arith.mulf %32, %32 : vector<8x128xf32>
    %34 = arith.mulf %23, %33 : vector<8x128xf32>
    %cst_12 = arith.constant 2.500000e-01 : f32
    %35 = vector.broadcast %cst_12 : f32 to vector<8x128xf32>
    %36 = arith.mulf %35, %7 : vector<8x128xf32>
    %cst_13 = arith.constant 1.000000e+00 : f32
    %37 = vector.broadcast %cst_13 : f32 to vector<8x128xf32>
    %38 = arith.subf %37, %7 : vector<8x128xf32>
    %cst_14 = arith.constant 7.500000e-01 : f32
    %39 = vector.broadcast %cst_14 : f32 to vector<8x128xf32>
    %40 = arith.mulf %39, %38 : vector<8x128xf32>
    %41 = arith.addf %36, %40 : vector<8x128xf32>
    %42 = arith.mulf %41, %34 : vector<8x128xf32>
    %cst_15 = arith.constant dense<0.000000e+00> : vector<128xf32>
    %43 = vector.multi_reduction <add>, %42, %cst_15 [0] : vector<8x128xf32> to vector<128xf32>
    %44 = vector.shape_cast %43 : vector<128xf32> to vector<1x128xf32>
    %c0_16 = arith.constant 0 : index
    %c0_17 = arith.constant 0 : index
    %c0_18 = arith.constant 0 : index
    %c0_19 = arith.constant 0 : index
    %45 = vector.load %arg4[%c0_16, %c0_17, %c0_18, %c0_19] : memref<1x1x1x128xf32, #tpu.memory_space<vmem>>, vector<1x1x1x128xf32>
    %46 = vector.shape_cast %45 : vector<1x1x1x128xf32> to vector<1x128xf32>
    %47 = vector.shape_cast %44 : vector<1x128xf32> to vector<1x1x1x128xf32>
    tpu.vector_store %arg4[%c0_16, %c0_17, %c0_18, %c0_19], %47 {strides = array<i32>} : memref<1x1x1x128xf32, #tpu.memory_space<vmem>>, vector<1x1x1x128xf32>,
    return
  }
  func.func @transform_0(%arg0: i32, %arg1: i32) -> (i32, i32, i32) {
    %c0_i32 = arith.constant 0 : i32
    %c0_i32_0 = arith.constant 0 : i32
    return %arg0, %c0_i32, %arg1 : i32, i32, i32
  }
  func.func @transform_1(%arg0: i32, %arg1: i32) -> (i32, i32, i32) {
    %c0_i32 = arith.constant 0 : i32
    %c0_i32_0 = arith.constant 0 : i32
    return %arg0, %c0_i32, %arg1 : i32, i32, i32
  }
  func.func @transform_2(%arg0: i32, %arg1: i32) -> (i32, i32, i32, i32) {
    %c0_i32 = arith.constant 0 : i32
    %c0_i32_0 = arith.constant 0 : i32
    %c0_i32_1 = arith.constant 0 : i32
    return %arg0, %arg1, %c0_i32, %c0_i32_0 : i32, i32, i32, i32
  }
}

</mosaic_0001>

<bundles_post_ra>
// kernel: tpu_custom_call.1
= control target key start
LH: loop header
LB: loop body
LE: loop exit
PB: predicated region body
PF: predicated region fallthrough
CT: control target
= control target key end

     0   :  { %7 = vsyncpa [#allocation3], 0  ;;  %s223_s0 = inlined_call_operand.hbm [shape: f32[1,8,128], index: 0, kind: input, shape index: {}]   ;;  %s224_s1 = inlined_call_operand.hbm [shape: s32[1,8,128], index: 1, kind: input, shape index: {}]   ;;  %s225_s2 = inlined_call_operand.hbm [shape: f32[1,1,1,128], index: 2, kind: output, shape index: {}]  }
   0x1   :  { %8 = vsyncpa [#allocation6], 0 }
   0x2   :  { %9 = vsyncpa [#allocation4], 0  ;;  %s168_s9 = smov [#allocation2]   ;;  %s169_s11 = smov [#allocation5]  }
   0x3   :  { %s16_s10 = sshll.u32 %s168_s9, 4  ;;  %s26_s12 = sshll.u32 %s169_s11, 4  ;;  %s17_s10 = int_to_ptr.vmem [resolvable:$true] %s16_s10  ;;  %s27_s12 = int_to_ptr.vmem [resolvable:$true] %s26_s12 }
   0x4   :  { %s96_s15 = scalar_lea.hbm %s223_s0, 128 }
   0x5   :  { %p97_p0 = scmp.ne.s32.totalorder %s223_s0, %s96_s15  ;;  %p100_p1 = scmp.lt.u32.totalorder %s96_s15, %s223_s0 }
   0x7   :  { %p102_p2 = pnand %p100_p1, %p97_p0 }
   0x9   :  { %105 = shalt.err (!%p102_p2)
}
   0xa   :  { %s106_s20 = scalar_lea.vmem %s17_s10, 128  ;;  %p111_p4 = scmp.lt.s32.totalorder %s17_s10, %s17_s10 }
   0xb   :  { %p107_p3 = scmp.ne.s32.totalorder %s17_s10, %s106_s20  ;;  %p112_p5 = scmp.lt.s32.totalorder %s106_s20, %s106_s20 }
   0xd   :  { %p113_p6 = por %p112_p5, %p111_p4 }
   0xf   :  { %p114_p7 = pnand %p113_p6, %p107_p3 }
  0x11   :  { %117 = shalt.err (!%p114_p7)
}
  0x12   :  { %19 = dma.hbm_to_vmem [thread:$0]  %s223_s0, 128, %s17_s10, [#allocation3]  }
  0x13   :  { %s118_s25 = scalar_lea.hbm %s224_s1, 128 }
  0x14   :  { %p119_p8 = scmp.ne.s32.totalorder %s224_s1, %s118_s25  ;;  %p122_p9 = scmp.lt.u32.totalorder %s118_s25, %s224_s1 }
  0x16   :  { %p124_p10 = pnand %p122_p9, %p119_p8 }
  0x18   :  { %127 = shalt.err (!%p124_p10)
}
  0x19   :  { %s128_s30 = scalar_lea.vmem %s27_s12, 128  ;;  %p133_p12 = scmp.lt.s32.totalorder %s27_s12, %s27_s12 }
  0x1a   :  { %p129_p11 = scmp.ne.s32.totalorder %s27_s12, %s128_s30  ;;  %p134_p13 = scmp.lt.s32.totalorder %s128_s30, %s128_s30 }
  0x1c   :  { %p135_p0 = por %p134_p13, %p133_p12 }
  0x1e   :  { %p136_p1 = pnand %p135_p0, %p129_p11 }
  0x20   :  { %139 = shalt.err (!%p136_p1)
}
  0x21   :  { %29 = dma.hbm_to_vmem [thread:$0]  %s224_s1, 128, %s27_s12, [#allocation6]  }
  0x22   :  { %162 = dma.done.wait [#allocation3], 128  }
  0x23   :  { %163 = vsyncadd [#allocation3], 4294967168 }
  0x24   :  { %164 = dma.done.wait [#allocation6], 128  }
  0x25   :  { %165 = vsyncadd [#allocation6], 4294967168  ;;  %v36_v0 = vld [vmem:[#allocation2] sm:$0xff]  ;;  %v37_v2 = vld [vmem:[#allocation5] sm:$0xff]  ;;  %v170_v4 = vmov 0.0   ;;  %s171_s1 = smov [#allocation7]  }
  0x26   :  { %v41_v1 = vmul.f32 0.5, %v36_v0  ;;  %vm38_vm0 = vcmp.eq.s32.totalorder %v37_v2, 0  ;;  %v45_v14 = vmax.f32 %v36_v0, 0.0  ;;  %s77_s4 = sshll.u32 %s171_s1, 4  ;;  %s78_s4 = int_to_ptr.vmem [resolvable:$true] %s77_s4 }
  0x27   :  { %v87_v5 = vsel %vm38_vm0, 1.0, %v170_v4  ;;  %s140_s5 = scalar_lea.vmem %s78_s4, 16  ;;  %s144_s6 = scalar_lea.vmem %s78_s4, 32 }
  0x28   :  { %92 = vtanh.f32 %v41_v1  ;;  %v54_v8 = vsub.f32 1.0, %v87_v5  ;;  %v46_v15 = vmul.f32 %v87_v5, %v36_v0  ;;  %v60_v18 = vmul.f32 0.25, %v87_v5  ;;  %p141_p2 = scmp.ne.s32.totalorder %s78_s4, %s140_s5  ;;  %p145_p3 = scmp.lt.s32.totalorder %s78_s4, %s78_s4 }
  0x29   :  { %p146_p4 = scmp.lt.s32.totalorder %s144_s6, %s140_s5 }
  0x2a   :  { %v47_v17 = vsub.f32 %v45_v14, %v46_v15  ;;  %v61_v19 = vmul.f32 0.75, %v54_v8 }
  0x2b   :  { %p147_p5 = por %p146_p4, %p145_p3 }
  0x2c   :  { %v62_v24 = vadd.f32 %v61_v19, %v60_v18 }
  0x2d   :  { %p148_p6 = pnand %p147_p5, %p141_p2 }
  0x32   :  { %v93_v3 = vpop.eup %92 }
  0x33   :  { %v43_v6 = vmul.f32 0.5, %v93_v3 }
  0x35   :  { %v44_v7 = vadd.f32 0.5, %v43_v6 }
  0x37   :  { %v48_v9 = vsub.f32 1.0, %v44_v7  ;;  %v53_v11 = vmul.f32 %v87_v5, %v44_v7 }
  0x39   :  { %v49_v10 = vmax.f32 %v44_v7, %v48_v9  ;;  %v55_v12 = vmul.f32 %v54_v8, %v48_v9 }
  0x3b   :  { %94 = vlog2.f32 %v49_v10  ;;  %v56_v13 = vadd.f32 %v55_v12, %v53_v11 }
  0x3d   :  { %v57_v16 = vsub.f32 1.0, %v56_v13 }
  0x3f   :  { %v58_v22 = vmul.f32 %v57_v16, %v57_v16 }
  0x45   :  { %v95_v20 = vpop.eup %94 }
  0x46   :  { %v51_v21 = vmul.f32 0.6931472, %v95_v20 }
  0x48   :  { %v52_v23 = vsub.f32 %v47_v17, %v51_v21 }
  0x4a   :  { %v59_v25 = vmul.f32 %v58_v22, %v52_v23 }
  0x4c   :  { %v63_v26 = vmul.f32 %v62_v24, %v59_v25 }
  0x4e   :  { %v64_v27 = vrot.slane %v63_v26, 4 }
  0x50   :  { %v65_v28 = vadd.f32 %v64_v27, %v63_v26 }
  0x52   :  { %v66_v29 = vrot.slane %v65_v28, 2 }
  0x54   :  { %v67_v30 = vadd.f32 %v66_v29, %v65_v28 }
  0x56   :  { %v68_v31 = vrot.slane %v67_v30, 1 }
  0x58   :  { %v69_v32 = vadd.f32 %v68_v31, %v67_v30 }
  0x5a   :  { %70 = vst [vmem:[#allocation7] sm:$0x1] %v69_v32 }
  0x5b   :  { %151 = shalt.err (!%p148_p6)
}
  0x5c   :  { %s152_s9 = scalar_lea.hbm %s225_s2, 16 }
  0x5d   :  { %p153_p7 = scmp.ne.s32.totalorder %s225_s2, %s152_s9  ;;  %p156_p8 = scmp.lt.u32.totalorder %s152_s9, %s225_s2 }
  0x5f   :  { %p158_p9 = pnand %p156_p8, %p153_p7 }
  0x61   :  { %161 = shalt.err (!%p158_p9)
}
  0x62   :  { %80 = dma.vmem_to_hbm [thread:$0]  %s78_s4, 16, %s225_s2, [#allocation4]  }
  0x63   :  { %166 = dma.done.wait [#allocation4], 16  }
  0x64   :  { %167 = vsyncadd [#allocation4], 4294967280 }
  0x65   :  { %84 = vsyncpa [#allocation3], 1 }
  0x66   :  { %85 = vsyncpa [#allocation6], 1 }
  0x67   :  { %86 = vsyncpa [#allocation4], 1 }

</bundles_post_ra>
